<compile_context>
chip_gen: v5e
topology: v5e:2x2
jax: 0.10.0
libtpu: 0.0.40
codegen_flags: <defaults>
</compile_context>

<pallas_src>
import math

import jax
import jax.numpy as jnp
from jax.experimental import pallas as pl
from jax.experimental.pallas import tpu as pltpu

_SQRT_2_OVER_PI = math.sqrt(2.0 / math.pi)

# Block sizing in *elements* (bytes halve for bf16, which only helps).
_TARGET_BLOCK_ELEMS = 512 * 1024     # ~2 MiB f32 per block (cap)
_MIN_BLOCK_ELEMS = 64 * 1024         # ~256 KiB f32 per block (floor)
_MIN_GRID_BLOCKS = 8                 # pipelining / per-core work target
_RAGGED_BLOCK_LANES = 32 * 1024      # ragged (1, n) path: 128 KiB f32 / block


def _gelu_kernel(x_ref, o_ref):
    # Upcast to f32 for the polynomial/tanh; cast back only at the store.
    x = x_ref[...].astype(jnp.float32)
    # sqrt(2/pi)*(x + 0.044715*x^3) == sqrt(2/pi)*x*(1 + 0.044715*x^2)
    inner = _SQRT_2_OVER_PI * x * (1.0 + 0.044715 * (x * x))
    y = 0.5 * x * (1.0 + jnp.tanh(inner))
    o_ref[...] = y.astype(o_ref.dtype)


def _pick_lanes(n: int) -> int:
    """Widest lane count (multiple of 128) that divides n; 0 if none."""
    for cand in (1024, 512, 256, 128):
        if n % cand == 0:
            return cand
    return 0


def _pick_row_tile(rows: int, lanes: int) -> int:
    """Row-tile: multiple of 8 (or == rows), ~256 KiB..2 MiB, >= 8 blocks."""
    if rows <= 8:
        return rows                                   # single full-dim block
    cap = max(8, (_TARGET_BLOCK_ELEMS // lanes) // 8 * 8)
    floor = max(8, (_MIN_BLOCK_ELEMS // lanes) // 8 * 8)
    tr = pl.cdiv(rows, _MIN_GRID_BLOCKS)              # aim for >= 8 blocks
    tr = max(floor, min(cap, tr))
    tr = ((tr + 7) // 8) * 8                          # sublane (8) alignment
    return min(tr, rows)                              # == rows is allowed


def gelu(x: jax.Array) -> jax.Array:
    """Tanh-approximate GELU, elementwise, via a Pallas TPU kernel."""
    orig_shape = x.shape
    n = x.size
    if n == 0:
        return x

    flat = x.reshape(-1)  # free for contiguous arrays

    lanes = _pick_lanes(n)
    if lanes:
        # ---- Aligned path: zero-copy reshape to (rows, lanes). ----
        rows = n // lanes
        x2d = flat.reshape(rows, lanes)
        tr = _pick_row_tile(rows, lanes)
        block = (tr, lanes)
        grid = (pl.cdiv(rows, tr),)
        index_map = lambda i: (i, 0)
    else:
        # ---- Ragged path: zero-copy reshape to (1, n); tile along lanes and
        # let Pallas mask the partial final block (no pad, no output slice).
        x2d = flat.reshape(1, n)
        if n <= _RAGGED_BLOCK_LANES:
            block = (1, n)                            # single full-dim block
            grid = (1,)
        else:
            block = (1, _RAGGED_BLOCK_LANES)
            grid = (pl.cdiv(n, _RAGGED_BLOCK_LANES),)
        index_map = lambda i: (0, i)

    out2d = pl.pallas_call(
        _gelu_kernel,
        out_shape=jax.ShapeDtypeStruct(x2d.shape, x.dtype),
        grid_spec=pltpu.PrefetchScalarGridSpec(
            num_scalar_prefetch=0,
            grid=grid,
            in_specs=[pl.BlockSpec(block, index_map)],
            out_specs=pl.BlockSpec(block, index_map),
        ),
        compiler_params=pltpu.CompilerParams(
            # TODO(synk): on v7x, verify in the Mosaic dump that "parallel"
            # shards the grid across both TensorCores (else switch to
            # pltpu.CORE_PARALLEL), and add pipeline_mode=pl.Buffered(3) if
            # xprof shows exposed DMA at 3.2 TB/s.
            dimension_semantics=("parallel",),
        ),
        cost_estimate=pl.CostEstimate(
            flops=9 * n,
            transcendentals=n,
            bytes_accessed=2 * n * x.dtype.itemsize,
        ),
    )(x2d)

    return out2d.reshape(orig_shape)


def gelu_reference(x: jax.Array) -> jax.Array:
    xf = x.astype(jnp.float32)
    c = math.sqrt(2.0 / math.pi)
    y = 0.5 * xf * (1.0 + jnp.tanh(c * (xf + 0.044715 * jnp.power(xf, 3))))
    return y.astype(x.dtype)


if __name__ == "__main__":
    key = jax.random.PRNGKey(0)
    k1, k2, k3 = jax.random.split(key, 3)

    # NCHW-style activation, 128-aligned fast path (2*4*16*16 = 2048 elems).
    x1 = jax.random.normal(k1, (2, 4, 16, 16), dtype=jnp.float32)
    y1 = jax.block_until_ready(gelu(x1))
    assert y1.shape == x1.shape and y1.dtype == x1.dtype
    assert jnp.allclose(y1, gelu_reference(x1), atol=1e-5, rtol=1e-5), \
        "mismatch vs reference (aligned path)"

    # Multi-block aligned path with a masked partial final row-block
    # (129 rows of 1024 lanes -> 3 blocks of 64 rows, last one partial).
    x2 = jax.random.normal(k2, (129, 1024), dtype=jnp.float32)
    y2 = jax.block_until_ready(gelu(x2))
    assert y2.shape == x2.shape and y2.dtype == x2.dtype
    assert jnp.allclose(y2, gelu_reference(x2), atol=1e-5, rtol=1e-5), \
        "mismatch vs reference (masked partial-block path)"

    # Ragged size (3*5*7 = 105 elements): pad-free (1, n) path.
    x3 = jax.random.normal(k3, (3, 5, 7), dtype=jnp.float32)
    y3 = jax.block_until_ready(gelu(x3))
    assert y3.shape == x3.shape and y3.dtype == x3.dtype
    assert jnp.allclose(y3, gelu_reference(x3), atol=1e-5, rtol=1e-5), \
        "mismatch vs reference (ragged path)"

    print("KERNEL_OK")
</pallas_src>

<mosaic_0001>
module attributes {stable_mosaic.version = 11 : i64} {
  func.func @_gelu_kernel(%arg0: i32, %arg1: memref<2x1024xf32, #tpu.memory_space<vmem>>, %arg2: memref<2x1024xf32, #tpu.memory_space<vmem>>) attributes {dimension_semantics = [#tpu.dimension_semantics<parallel>], iteration_bounds = array<i64: 1>, scalar_prefetch = 0 : i64, scratch_operands = 0 : i64, tpu.core_type = #tpu.core_type<tc>, window_params = [{transform_indices = @transform_0, window_bounds = array<i64: 2, 1024>}, {transform_indices = @transform_1, window_bounds = array<i64: 2, 1024>}]} {
    %c0 = arith.constant 0 : index
    %c0_0 = arith.constant 0 : index
    %0 = vector.load %arg1[%c0, %c0_0] : memref<2x1024xf32, #tpu.memory_space<vmem>>, vector<2x1024xf32>
    %cst = arith.constant 0.797884583 : f32
    %1 = vector.broadcast %cst : f32 to vector<2x1024xf32>
    %2 = arith.mulf %1, %0 : vector<2x1024xf32>
    %3 = arith.mulf %0, %0 : vector<2x1024xf32>
    %cst_1 = arith.constant 4.471500e-02 : f32
    %4 = vector.broadcast %cst_1 : f32 to vector<2x1024xf32>
    %5 = arith.mulf %4, %3 : vector<2x1024xf32>
    %cst_2 = arith.constant 1.000000e+00 : f32
    %6 = vector.broadcast %cst_2 : f32 to vector<2x1024xf32>
    %7 = arith.addf %6, %5 : vector<2x1024xf32>
    %8 = arith.mulf %2, %7 : vector<2x1024xf32>
    %cst_3 = arith.constant 5.000000e-01 : f32
    %9 = vector.broadcast %cst_3 : f32 to vector<2x1024xf32>
    %10 = arith.mulf %9, %0 : vector<2x1024xf32>
    %11 = math.tanh %8 : vector<2x1024xf32>
    %cst_4 = arith.constant 1.000000e+00 : f32
    %12 = vector.broadcast %cst_4 : f32 to vector<2x1024xf32>
    %13 = arith.addf %12, %11 : vector<2x1024xf32>
    %14 = arith.mulf %10, %13 : vector<2x1024xf32>
    %c0_5 = arith.constant 0 : index
    %c0_6 = arith.constant 0 : index
    %15 = vector.load %arg2[%c0_5, %c0_6] : memref<2x1024xf32, #tpu.memory_space<vmem>>, vector<2x1024xf32>
    tpu.vector_store %arg2[%c0_5, %c0_6], %14 {strides = array<i32>} : memref<2x1024xf32, #tpu.memory_space<vmem>>, vector<2x1024xf32>,
    return
  }
  func.func @transform_0(%arg0: i32) -> (i32, i32) {
    %c0_i32 = arith.constant 0 : i32
    %c0_i32_0 = arith.constant 0 : i32
    return %arg0, %c0_i32 : i32, i32
  }
  func.func @transform_1(%arg0: i32) -> (i32, i32) {
    %c0_i32 = arith.constant 0 : i32
    %c0_i32_0 = arith.constant 0 : i32
    return %arg0, %c0_i32 : i32, i32
  }
}

</mosaic_0001>

<bundles_post_ra>
// kernel: tpu_custom_call.1
= control target key start
LH: loop header
LB: loop body
LE: loop exit
PB: predicated region body
PF: predicated region fallthrough
CT: control target
= control target key end

     0   :  { %6 = vsyncpa [#allocation3], 0  ;;  %s138_s0 = inlined_call_operand.hbm [shape: f32[2,1024], index: 0, kind: input, shape index: {}]   ;;  %s139_s1 = inlined_call_operand.hbm [shape: f32[2,1024], index: 1, kind: output, shape index: {}]  }
   0x1   :  { %7 = vsyncpa [#allocation4], 0  ;;  %s13_s8 = sshll.u32 %s138_s0, 4  ;;  %s120_s9 = smov [#allocation2]   ;;  %s14_s8 = int_to_ptr.hbm [resolvable:$true] %s13_s8 }
   0x2   :  { %s15_s10 = sshll.u32 %s120_s9, 4  ;;  %s16_s10 = int_to_ptr.vmem [resolvable:$true] %s15_s10 }
   0x3   :  { %18 = dma.hbm_to_vmem [thread:$0]  %s14_s8, 256, %s16_s10, [#allocation3]  }
   0x4   :  { %116 = dma.done.wait [#allocation3], 256  }
   0x5   :  { %117 = vsyncadd [#allocation3], 4294967040  ;;  %v23_v0 = vld [vmem:[#allocation2] sm:$0xff]  ;;  %v24_v1 = vld [vmem:[#allocation2 + $0x8] sm:$0xff]  ;;  %s121_s0 = smov [#allocation5]   ;;  %s52_s14 = sshll.u32 %s139_s1, 4  ;;  %s53_s14 = int_to_ptr.hbm [resolvable:$true] %s52_s14 }
   0x6   :  { %v27_v2 = vmul.f32 %v23_v0, %v23_v0  ;;  %v28_v3 = vmul.f32 %v24_v1, %v24_v1  ;;  %v25_v4 = vmul.f32 0.7978846, %v23_v0  ;;  %v26_v6 = vmul.f32 0.7978846, %v24_v1  ;;  %s50_s11 = sshll.u32 %s121_s0, 4  ;;  %s51_s11 = int_to_ptr.vmem [resolvable:$true] %s50_s11 }
   0x7   :  { %v35_v12 = vmul.f32 0.5, %v23_v0  ;;  %v36_v14 = vmul.f32 0.5, %v24_v1 }
   0x8   :  { %v29_v5 = vmul.f32 0.044715, %v27_v2  ;;  %v30_v7 = vmul.f32 0.044715, %v28_v3 }
   0xa   :  { %v31_v8 = vadd.f32 1.0, %v29_v5  ;;  %v32_v9 = vadd.f32 1.0, %v30_v7 }
   0xc   :  { %v33_v10 = vmul.f32 %v31_v8, %v25_v4  ;;  %v34_v11 = vmul.f32 %v32_v9, %v26_v6 }
   0xe   :  { %64 = vtanh.f32 %v33_v10 }
   0xf   :  { %66 = vtanh.f32 %v34_v11 }
  0x14   :  { %v65_v13 = vpop.eup %64 }
  0x15   :  { %v67_v15 = vpop.eup %66  ;;  %v39_v16 = vadd.f32 1.0, %v65_v13 }
  0x16   :  { %v40_v17 = vadd.f32 1.0, %v67_v15 }
  0x17   :  { %v41_v18 = vmul.f32 %v39_v16, %v35_v12 }
  0x18   :  { %v42_v19 = vmul.f32 %v40_v17, %v36_v14 }
  0x19   :  { %43 = vst [vmem:[#allocation5] sm:$0xff] %v41_v18 }
  0x1a   :  { %44 = vst [vmem:[#allocation5 + $0x8] sm:$0xff] %v42_v19 }
  0x1b   :  { %55 = dma.vmem_to_hbm [thread:$0]  %s51_s11, 256, %s53_s14, [#allocation4]  }
  0x1c   :  { %118 = dma.done.wait [#allocation4], 256  }
  0x1d   :  { %119 = vsyncadd [#allocation4], 4294967040 }
  0x1e   :  { %60 = vsyncpa [#allocation3], 1 }
  0x1f   :  { %61 = vsyncpa [#allocation4], 1 }

</bundles_post_ra>
